<compile_context>
chip_gen: v7x
topology: tpu7x:2x2x1
jax: 0.10.0
libtpu: 0.0.40
codegen_flags: <defaults>
</compile_context>

<pallas_src>
import functools

import jax
import jax.numpy as jnp
from jax import lax
from jax.experimental import pallas as pl
from jax.experimental.pallas import tpu as pltpu


def rnn_kernel(x_ref, w_ih_ref, w_hh_ref, b_ref, lw_ref, lb_ref, out_ref,
               xproj_ref, *, seq_len, batch):
    """Single-invocation kernel: whole sequence resident in VMEM.

    x_ref     : (T*B, D_in)  seq-major, row t*B + b == timestep t of batch b
    w_ih_ref  : (D_in, H)
    w_hh_ref  : (H, H)
    b_ref     : (1, H)        (b_ih; b_hh is zero in the module)
    lw_ref    : (H, D_out)
    lb_ref    : (1, D_out)
    out_ref   : (B, D_out)
    xproj_ref : (T*B, H)      VMEM scratch for the hoisted input projection
    """
    hidden = w_hh_ref.shape[0]
    w_hh = w_hh_ref[...]

    # (1) Hoisted input projection: one batched matmul over all timesteps,
    #     bias folded in. Pipelines through the MXU instead of T serial pushes.
    xproj_ref[...] = (
        jnp.dot(x_ref[...], w_ih_ref[...], preferred_element_type=jnp.float32)
        + b_ref[...]
    )

    # (2) Serial recurrence; h is a fori_loop carry (lives in vregs, no VMEM
    #     round-trip on the dependency chain). Fully unrolled for LLO visibility.
    def step(t, h):
        x_t = xproj_ref[pl.ds(t * batch, batch), :]
        return jnp.tanh(x_t + jnp.dot(h, w_hh, preferred_element_type=jnp.float32))

    h_final = lax.fori_loop(
        0, seq_len, step, jnp.zeros((batch, hidden), jnp.float32), unroll=True)

    # (3) Affine readout of the final hidden state.
    out_ref[...] = (
        jnp.dot(h_final, lw_ref[...], preferred_element_type=jnp.float32)
        + lb_ref[...]
    ).astype(out_ref.dtype)


def model_forward(xs, rnn_param, linear_wb, *, d_in, d_hidden, d_out):
    """xs: (B, T, D_in) float32 (batch_first, like the PyTorch module)."""
    B, T, _ = xs.shape
    # seq-major, then flatten so row t*B + b holds timestep t of batch element b.
    x_flat = jnp.transpose(xs, (1, 0, 2)).reshape(T * B, d_in)

    w_ih = rnn_param[:d_in]                      # (D_in, H)
    w_hh = rnn_param[d_in:d_in + d_hidden]       # (H, H)
    b_ih = rnn_param[-1][None, :]                # (1, H)
    lin_w = linear_wb[:-1]                       # (H, D_out)
    lin_b = linear_wb[-1][None, :]               # (1, D_out)

    vmem_specs = [pl.BlockSpec(memory_space=pltpu.MemorySpace.VMEM)
                  for _ in range(6)]

    return pl.pallas_call(
        functools.partial(rnn_kernel, seq_len=T, batch=B),
        out_shape=jax.ShapeDtypeStruct((B, d_out), jnp.float32),
        in_specs=vmem_specs,
        out_specs=pl.BlockSpec(memory_space=pltpu.MemorySpace.VMEM),
        scratch_shapes=[pltpu.VMEM((T * B, d_hidden), jnp.float32)],
    )(x_flat, w_ih, w_hh, b_ih, lin_w, lin_b)


def reference_forward(xs, rnn_param, linear_wb, *, d_in, d_hidden):
    """Pure-JAX reference matching torch._VF.rnn_tanh semantics."""
    w_ih = rnn_param[:d_in]
    w_hh = rnn_param[d_in:d_in + d_hidden]
    b = rnn_param[-1]
    lin_w, lin_b = linear_wb[:-1], linear_wb[-1]

    def step(h, x_t):
        return jnp.tanh(jnp.dot(x_t, w_ih) + jnp.dot(h, w_hh) + b), None

    h0 = jnp.zeros((xs.shape[0], d_hidden), jnp.float32)
    h_final, _ = lax.scan(step, h0, jnp.transpose(xs, (1, 0, 2)))
    return jnp.dot(h_final, lin_w) + lin_b


def init_rnn_param(key, in_dim, hidden):
    """Mirror AffineRNN.rnn_weight_initialization: normal init, orthogonal w_hh, zero bias."""
    std = (3.0 * (in_dim + hidden)) ** (-0.5)
    w = jax.random.normal(key, (in_dim + hidden, hidden), jnp.float32) * std
    q, _ = jnp.linalg.qr(w[in_dim:])
    w = w.at[in_dim:].set(q)
    b = jnp.zeros((1, hidden), jnp.float32)
    return jnp.concatenate([w, b], axis=0)        # (in_dim + hidden + 1, hidden)


if __name__ == "__main__":
    # Small, module-consistent shapes.
    batch_size, seq_len = 2, 8
    dim_in, dim_hidden, dim_out = 4, 32, 16

    key = jax.random.PRNGKey(0)
    k_x, k_p, k_l = jax.random.split(key, 3)

    xs = jax.random.normal(k_x, (batch_size, seq_len, dim_in), jnp.float32)
    rnn_param = init_rnn_param(k_p, dim_in, dim_hidden)
    linear_wb = jnp.concatenate(
        [0.1 * jax.random.normal(k_l, (dim_hidden, dim_out), jnp.float32),
         jnp.zeros((1, dim_out), jnp.float32)], axis=0)

    out = model_forward(xs, rnn_param, linear_wb,
                        d_in=dim_in, d_hidden=dim_hidden, d_out=dim_out)
    out = jax.block_until_ready(out)

    ref = reference_forward(xs, rnn_param, linear_wb,
                            d_in=dim_in, d_hidden=dim_hidden)
    assert out.shape == (batch_size, dim_out)
    # Tolerance accounts for default (non-HIGHEST) MXU precision in both paths.
    assert jnp.allclose(out, ref, atol=2e-2, rtol=2e-2), "mismatch vs reference"

    print("KERNEL_OK")
</pallas_src>

<mosaic_0001>
module attributes {stable_mosaic.version = 11 : i64} {
  func.func @rnn_kernel(%arg0: memref<16x4xf32, #tpu.memory_space<vmem>>, %arg1: memref<4x32xf32, #tpu.memory_space<vmem>>, %arg2: memref<32x32xf32, #tpu.memory_space<vmem>>, %arg3: memref<1x32xf32, #tpu.memory_space<vmem>>, %arg4: memref<32x16xf32, #tpu.memory_space<vmem>>, %arg5: memref<1x16xf32, #tpu.memory_space<vmem>>, %arg6: memref<2x16xf32, #tpu.memory_space<vmem>>, %arg7: memref<16x32xf32, #tpu.memory_space<vmem>>) attributes {dimension_semantics = [], scalar_prefetch = 0 : i64, scratch_operands = 1 : i64, tpu.core_type = #tpu.core_type<tc>} {
    %c0 = arith.constant 0 : index
    %c0_0 = arith.constant 0 : index
    %0 = vector.load %arg2[%c0, %c0_0] : memref<32x32xf32, #tpu.memory_space<vmem>>, vector<32x32xf32>
    %c0_1 = arith.constant 0 : index
    %c0_2 = arith.constant 0 : index
    %1 = vector.load %arg0[%c0_1, %c0_2] : memref<16x4xf32, #tpu.memory_space<vmem>>, vector<16x4xf32>
    %c0_3 = arith.constant 0 : index
    %c0_4 = arith.constant 0 : index
    %2 = vector.load %arg1[%c0_3, %c0_4] : memref<4x32xf32, #tpu.memory_space<vmem>>, vector<4x32xf32>
    %cst = arith.constant dense<0.000000e+00> : vector<16x32xf32>
    %3 = tpu.matmul %1, %2, %cst {dimension_numbers = #tpu.dot_dimension_numbers<[1], [0], [0], [1], [0, 0, 1, 1], [], []>} : vector<16x4xf32>, vector<4x32xf32>, vector<16x32xf32> -> vector<16x32xf32>
    %c0_5 = arith.constant 0 : index
    %c0_6 = arith.constant 0 : index
    %4 = vector.load %arg3[%c0_5, %c0_6] : memref<1x32xf32, #tpu.memory_space<vmem>>, vector<1x32xf32>
    %5 = vector.broadcast %4 : vector<1x32xf32> to vector<16x32xf32>
    %6 = arith.addf %3, %5 : vector<16x32xf32>
    %c0_7 = arith.constant 0 : index
    %c0_8 = arith.constant 0 : index
    %7 = vector.load %arg7[%c0_7, %c0_8] : memref<16x32xf32, #tpu.memory_space<vmem>>, vector<16x32xf32>
    tpu.vector_store %arg7[%c0_7, %c0_8], %6 {strides = array<i32>} : memref<16x32xf32, #tpu.memory_space<vmem>>, vector<16x32xf32>,
    %cst_9 = arith.constant 0.000000e+00 : f32
    %8 = vector.broadcast %cst_9 : f32 to vector<2x32xf32>
    %c0_i32 = arith.constant 0 : i32
    %c2_i32 = arith.constant 2 : i32
    %9 = arith.muli %c0_i32, %c2_i32 : i32
    %10 = arith.index_cast %9 : i32 to index
    %c0_10 = arith.constant 0 : index
    %11 = vector.load %arg7[%10, %c0_10] : memref<16x32xf32, #tpu.memory_space<vmem>>, vector<2x32xf32>
    %cst_11 = arith.constant dense<0.000000e+00> : vector<2x32xf32>
    %12 = tpu.matmul %8, %0, %cst_11 {dimension_numbers = #tpu.dot_dimension_numbers<[1], [0], [0], [1], [0, 0, 1, 1], [], []>} : vector<2x32xf32>, vector<32x32xf32>, vector<2x32xf32> -> vector<2x32xf32>
    %13 = arith.addf %11, %12 : vector<2x32xf32>
    %14 = math.tanh %13 : vector<2x32xf32>
    %c1_i32 = arith.constant 1 : i32
    %c2_i32_12 = arith.constant 2 : i32
    %15 = arith.muli %c1_i32, %c2_i32_12 : i32
    %16 = arith.index_cast %15 : i32 to index
    %c0_13 = arith.constant 0 : index
    %17 = vector.load %arg7[%16, %c0_13] : memref<16x32xf32, #tpu.memory_space<vmem>>, vector<2x32xf32>
    %cst_14 = arith.constant dense<0.000000e+00> : vector<2x32xf32>
    %18 = tpu.matmul %14, %0, %cst_14 {dimension_numbers = #tpu.dot_dimension_numbers<[1], [0], [0], [1], [0, 0, 1, 1], [], []>} : vector<2x32xf32>, vector<32x32xf32>, vector<2x32xf32> -> vector<2x32xf32>
    %19 = arith.addf %17, %18 : vector<2x32xf32>
    %20 = math.tanh %19 : vector<2x32xf32>
    %c2_i32_15 = arith.constant 2 : i32
    %c2_i32_16 = arith.constant 2 : i32
    %21 = arith.muli %c2_i32_15, %c2_i32_16 : i32
    %22 = arith.index_cast %21 : i32 to index
    %c0_17 = arith.constant 0 : index
    %23 = vector.load %arg7[%22, %c0_17] : memref<16x32xf32, #tpu.memory_space<vmem>>, vector<2x32xf32>
    %cst_18 = arith.constant dense<0.000000e+00> : vector<2x32xf32>
    %24 = tpu.matmul %20, %0, %cst_18 {dimension_numbers = #tpu.dot_dimension_numbers<[1], [0], [0], [1], [0, 0, 1, 1], [], []>} : vector<2x32xf32>, vector<32x32xf32>, vector<2x32xf32> -> vector<2x32xf32>
    %25 = arith.addf %23, %24 : vector<2x32xf32>
    %26 = math.tanh %25 : vector<2x32xf32>
    %c3_i32 = arith.constant 3 : i32
    %c2_i32_19 = arith.constant 2 : i32
    %27 = arith.muli %c3_i32, %c2_i32_19 : i32
    %28 = arith.index_cast %27 : i32 to index
    %c0_20 = arith.constant 0 : index
    %29 = vector.load %arg7[%28, %c0_20] : memref<16x32xf32, #tpu.memory_space<vmem>>, vector<2x32xf32>
    %cst_21 = arith.constant dense<0.000000e+00> : vector<2x32xf32>
    %30 = tpu.matmul %26, %0, %cst_21 {dimension_numbers = #tpu.dot_dimension_numbers<[1], [0], [0], [1], [0, 0, 1, 1], [], []>} : vector<2x32xf32>, vector<32x32xf32>, vector<2x32xf32> -> vector<2x32xf32>
    %31 = arith.addf %29, %30 : vector<2x32xf32>
    %32 = math.tanh %31 : vector<2x32xf32>
    %c4_i32 = arith.constant 4 : i32
    %c2_i32_22 = arith.constant 2 : i32
    %33 = arith.muli %c4_i32, %c2_i32_22 : i32
    %34 = arith.index_cast %33 : i32 to index
    %c0_23 = arith.constant 0 : index
    %35 = vector.load %arg7[%34, %c0_23] : memref<16x32xf32, #tpu.memory_space<vmem>>, vector<2x32xf32>
    %cst_24 = arith.constant dense<0.000000e+00> : vector<2x32xf32>
    %36 = tpu.matmul %32, %0, %cst_24 {dimension_numbers = #tpu.dot_dimension_numbers<[1], [0], [0], [1], [0, 0, 1, 1], [], []>} : vector<2x32xf32>, vector<32x32xf32>, vector<2x32xf32> -> vector<2x32xf32>
    %37 = arith.addf %35, %36 : vector<2x32xf32>
    %38 = math.tanh %37 : vector<2x32xf32>
    %c5_i32 = arith.constant 5 : i32
    %c2_i32_25 = arith.constant 2 : i32
    %39 = arith.muli %c5_i32, %c2_i32_25 : i32
    %40 = arith.index_cast %39 : i32 to index
    %c0_26 = arith.constant 0 : index
    %41 = vector.load %arg7[%40, %c0_26] : memref<16x32xf32, #tpu.memory_space<vmem>>, vector<2x32xf32>
    %cst_27 = arith.constant dense<0.000000e+00> : vector<2x32xf32>
    %42 = tpu.matmul %38, %0, %cst_27 {dimension_numbers = #tpu.dot_dimension_numbers<[1], [0], [0], [1], [0, 0, 1, 1], [], []>} : vector<2x32xf32>, vector<32x32xf32>, vector<2x32xf32> -> vector<2x32xf32>
    %43 = arith.addf %41, %42 : vector<2x32xf32>
    %44 = math.tanh %43 : vector<2x32xf32>
    %c6_i32 = arith.constant 6 : i32
    %c2_i32_28 = arith.constant 2 : i32
    %45 = arith.muli %c6_i32, %c2_i32_28 : i32
    %46 = arith.index_cast %45 : i32 to index
    %c0_29 = arith.constant 0 : index
    %47 = vector.load %arg7[%46, %c0_29] : memref<16x32xf32, #tpu.memory_space<vmem>>, vector<2x32xf32>
    %cst_30 = arith.constant dense<0.000000e+00> : vector<2x32xf32>
    %48 = tpu.matmul %44, %0, %cst_30 {dimension_numbers = #tpu.dot_dimension_numbers<[1], [0], [0], [1], [0, 0, 1, 1], [], []>} : vector<2x32xf32>, vector<32x32xf32>, vector<2x32xf32> -> vector<2x32xf32>
    %49 = arith.addf %47, %48 : vector<2x32xf32>
    %50 = math.tanh %49 : vector<2x32xf32>
    %c7_i32 = arith.constant 7 : i32
    %c2_i32_31 = arith.constant 2 : i32
    %51 = arith.muli %c7_i32, %c2_i32_31 : i32
    %52 = arith.index_cast %51 : i32 to index
    %c0_32 = arith.constant 0 : index
    %53 = vector.load %arg7[%52, %c0_32] : memref<16x32xf32, #tpu.memory_space<vmem>>, vector<2x32xf32>
    %cst_33 = arith.constant dense<0.000000e+00> : vector<2x32xf32>
    %54 = tpu.matmul %50, %0, %cst_33 {dimension_numbers = #tpu.dot_dimension_numbers<[1], [0], [0], [1], [0, 0, 1, 1], [], []>} : vector<2x32xf32>, vector<32x32xf32>, vector<2x32xf32> -> vector<2x32xf32>
    %55 = arith.addf %53, %54 : vector<2x32xf32>
    %56 = math.tanh %55 : vector<2x32xf32>
    %c8_i32 = arith.constant 8 : i32
    %c0_34 = arith.constant 0 : index
    %c0_35 = arith.constant 0 : index
    %57 = vector.load %arg4[%c0_34, %c0_35] : memref<32x16xf32, #tpu.memory_space<vmem>>, vector<32x16xf32>
    %cst_36 = arith.constant dense<0.000000e+00> : vector<2x16xf32>
    %58 = tpu.matmul %56, %57, %cst_36 {dimension_numbers = #tpu.dot_dimension_numbers<[1], [0], [0], [1], [0, 0, 1, 1], [], []>} : vector<2x32xf32>, vector<32x16xf32>, vector<2x16xf32> -> vector<2x16xf32>
    %c0_37 = arith.constant 0 : index
    %c0_38 = arith.constant 0 : index
    %59 = vector.load %arg5[%c0_37, %c0_38] : memref<1x16xf32, #tpu.memory_space<vmem>>, vector<1x16xf32>
    %60 = vector.broadcast %59 : vector<1x16xf32> to vector<2x16xf32>
    %61 = arith.addf %58, %60 : vector<2x16xf32>
    %c0_39 = arith.constant 0 : index
    %c0_40 = arith.constant 0 : index
    %62 = vector.load %arg6[%c0_39, %c0_40] : memref<2x16xf32, #tpu.memory_space<vmem>>, vector<2x16xf32>
    tpu.vector_store %arg6[%c0_39, %c0_40], %61 {strides = array<i32>} : memref<2x16xf32, #tpu.memory_space<vmem>>, vector<2x16xf32>,
    return
  }
}

</mosaic_0001>

<bundles_post_ra>
// kernel: tpu_custom_call.1
= control target key start
LH: loop header
LB: loop body
LE: loop exit
PB: predicated region body
PF: predicated region fallthrough
CT: control target
= control target key end

     0   :  { %vm45_vm0 = vcmask 1043456   ;;  %vm38_vm1 = vcmask 31744   ;;  %v1098_v6 = vmov 0.0|0.0   ;;  %s1255_s0 = inlined_call_operand.vmem [shape: f32[16,4], index: 0, kind: input, shape index: {}]   ;;  %s1256_s1 = inlined_call_operand.vmem [shape: f32[4,32], index: 1, kind: input, shape index: {}]   ;;  %s1257_s2 = inlined_call_operand.vmem [shape: f32[32,32], index: 2, kind: input, shape index: {}]   ;;  %s1258_s3 = inlined_call_operand.vmem [shape: f32[1,32], index: 3, kind: input, shape index: {}]   ;;  %s1259_s4 = inlined_call_operand.vmem [shape: f32[32,16], index: 4, kind: input, shape index: {}]   ;;  %s1260_s5 = inlined_call_operand.vmem [shape: f32[1,16], index: 5, kind: input, shape index: {}]   ;;  %s1261_s6 = inlined_call_operand.hbm [shape: f32[2,16], index: 6, kind: output, shape index: {}]  }
   0x1   :  { %v30_v0 = vld [vmem:[%s1256_s1] sm:$0xf]  ;;  %v29_v2 = vld [vmem:[%s1255_s0 + $0x8] sm:$0xff]  ;;  %v26_v5 = vld [vmem:[%s1257_s2 + $0x10] sm:$0xff]  ;;  %1000 = vmatprep.subr.bf16.mxu1 %v1098_v6 }
   0x2   :  { %v28_v1 = vld [vmem:[%s1255_s0] sm:$0xff]  ;;  %896 = vmatprep.subr.msk.mxu0 %vm45_vm0, %v30_v0  ;;  %v25_v4 = vld [vmem:[%s1257_s2 + $0x8] sm:$0xff]  ;;  %v27_v8 = vld [vmem:[%s1257_s2 + $0x18] sm:$0xff] }
   0x3   :  { %898 = vmatprep.mubr.msk.f32.mxu0 %vm38_vm1, %v28_v1  ;;  %v24_v3 = vld [vmem:[%s1257_s2] sm:$0xff]  ;;  %897 = vmatpush3.msk.msra.mxu0 %vm45_vm0, %v30_v0 }
   0x4   :  { %v1156_v7 = vpack.c.bf16 %v25_v4, %v24_v3 }
   0x5   :  { %11 = vsyncpa [#allocation4], 0  ;;  %899 = vmatmul.mubr.msk.f32.vlgmr.msra.gmra.mrb[0].mxu0 %vm38_vm1, %v29_v2  ;;  %vm1099_vm2 = vmmov 0   ;;  %v1100_v9 = vmov 0.0   ;;  %v1164_v10 = vpack.c.bf16 %v27_v8, %v26_v5  ;;  %1006 = vmatprep.subr.bf16.mxu0 %v1098_v6  ;;  %v835_v11 = vld [vmem:[%s1258_s3] ss:$0 sm:$0xff] }
   0x6   :  { %909 = vmatprep.mubr.msk.f32.mxu1 %vm1099_vm2, %v1100_v9  ;;  %1002 = vmatpush3.bf16.msra.mxu1 %v1156_v7  ;;  %vm124_vm3 = vcmask 261120   ;;  %v735_v51 = vld [vmem:[%s1259_s4] sm:$0xff]  ;;  %v736_v52 = vld [vmem:[%s1259_s4 + $0x8] sm:$0xff]  ;;  %v737_v53 = vld [vmem:[%s1259_s4 + $0x10] sm:$0xff]  ;;  %s1101_s19 = smov [#allocation3]   ;;  %vm819_vm4 = vcmask 123904  }
   0x7   :  { %1003 = vmatprep.subr.bf16.mxu1 %v1098_v6  ;;  %1008 = vmatpush3.bf16.msra.mxu0 %v1156_v7  ;;  %v1049_v54 = vpack.c.bf16 %v736_v52, %v735_v51  ;;  %v738_v55 = vld [vmem:[%s1259_s4 + $0x18] sm:$0xff]  ;;  %v846_v62 = vld [vmem:[%s1260_s5] ss:$0 sm:$0xff]  ;;  %s827_s20 = sshll.u32 %s1101_s19, 4  ;;  %s828_s20 = int_to_ptr.vmem [resolvable:$true] %s827_s20 }
   0x8   :  { %1009 = vmatprep.subr.bf16.mxu0 %v1098_v6  ;;  %920 = vmatprep.mubr.msk.f32.mxu0 %vm1099_vm2, %v1100_v9  ;;  %v1052_v56 = vpack.c.bf16 %v738_v55, %v737_v53  ;;  %s1074_s4 = scalar_lea.vmem %s828_s20, 32  ;;  %p1079_p1 = scmp.lt.s32.totalorder %s828_s20, %s828_s20 }
   0x9   :  { %p1075_p0 = scmp.ne.s32.totalorder %s828_s20, %s1074_s4  ;;  %p1080_p2 = scmp.lt.s32.totalorder %s1074_s4, %s1074_s4 }
   0xa   :  { %1005 = vmatpush3.bf16.msra.mxu1 %v1164_v10 }
   0xb   :  { %1011 = vmatpush3.bf16.msra.mxu0 %v1164_v10  ;;  %1012 = vmatprep.subr.bf16.mxu1 %v1098_v6  ;;  %p1081_p3 = por %p1080_p2, %p1079_p1 }
   0xc   :  { %1018 = vmatprep.subr.bf16.mxu0 %v1098_v6 }
   0xd   :  { %910 = vmatmul.mubr.f32.vlgmr.msra.gmra.mrb[0].mxu1 %v1100_v9  ;;  %p1082_p4 = pnand %p1081_p3, %p1075_p0 }
   0xe   :  { %1014 = vmatpush3.bf16.msra.mxu1 %v1156_v7  ;;  %931 = vmatprep.mubr.msk.f32.mxu1 %vm1099_vm2, %v1100_v9 }
   0xf   :  { %1015 = vmatprep.subr.bf16.mxu1 %v1098_v6 }
  0x12   :  { %1017 = vmatpush3.bf16.msra.mxu1 %v1164_v10 }
  0x13   :  { %1024 = vmatprep.subr.bf16.mxu1 %v1098_v6 }
  0xd8   :  { %v900_v12 = vpop.f32.mrb[0].mxu0 }
  0xd9   :  { %v121_v13 = vadd.f32 %v900_v12, %v835_v11  ;;  %v115_v14 = vpop.f32.mrb[1].mxu0 }
  0xda   :  { %v116_v15 = vadd.f32 %v835_v11, %v115_v14 }
  0xdb   :  { %126 = vst.msk [vmem:[#allocation2 + $0x8] sm:$0xff] %vm124_vm3, %v121_v13 }
  0xdc   :  { %125 = vst.msk [vmem:[#allocation2] sm:$0xff] %vm124_vm3, %v116_v15 }
  0xe0   :  { %v197_v16 = vpop.f32.mrb[0].mxu1 }
  0xe1   :  { %v911_v17 = vpop.f32.mrb[1].mxu1 }
  0xe2   :  { %v431_v36 = vld [vmem:[#allocation2 + $0x8] sm:$0x3]  ;;  %v507_v41 = vld [vmem:[#allocation2 + $0xa] sm:$0x3]  ;;  %v583_v46 = vld [vmem:[#allocation2 + $0xc] sm:$0x3] }
  0xe3   :  { %v127_v18 = vld [vmem:[#allocation2] sm:$0x3]  ;;  %v203_v21 = vld [vmem:[#allocation2 + $0x2] sm:$0x3]  ;;  %v279_v26 = vld [vmem:[#allocation2 + $0x4] sm:$0x3] }
  0xe4   :  { %v201_v19 = vadd.f32 %v197_v16, %v127_v18  ;;  %v355_v31 = vld [vmem:[#allocation2 + $0x6] sm:$0x3]  ;;  %v659_v57 = vld [vmem:[#allocation2 + $0xe] sm:$0x3] }
  0xe6   :  { %1058 = vtanh.f32 %v201_v19 }
  0xf0   :  { %v1059_v20 = vpop.eup %1058 }
  0xf1   :  { %921 = vmatmul.mubr.msk.f32.vlgmr.msra.gmra.mrb[2].mxu0 %vm124_vm3, %v1059_v20 }
  0xf2   :  { %1020 = vmatpush3.bf16.msra.mxu0 %v1156_v7  ;;  %942 = vmatprep.mubr.msk.f32.mxu0 %vm1099_vm2, %v1100_v9 }
  0xf3   :  { %1021 = vmatprep.subr.bf16.mxu0 %v1098_v6 }
  0xf6   :  { %1023 = vmatpush3.bf16.msra.mxu0 %v1164_v10 }
  0xf7   :  { %1030 = vmatprep.subr.bf16.mxu0 %v1098_v6 }
 0x1c4   :  { %v273_v22 = vpop.f32.mrb[2].mxu0 }
 0x1c5   :  { %v277_v23 = vadd.f32 %v273_v22, %v203_v21  ;;  %v922_v24 = vpop.f32.mrb[3].mxu0 }
 0x1c7   :  { %1060 = vtanh.f32 %v277_v23 }
 0x1d1   :  { %v1061_v25 = vpop.eup %1060 }
 0x1d2   :  { %932 = vmatmul.mubr.msk.f32.vlgmr.msra.gmra.mrb[2].mxu1 %vm124_vm3, %v1061_v25 }
 0x1d3   :  { %1026 = vmatpush3.bf16.msra.mxu1 %v1156_v7  ;;  %953 = vmatprep.mubr.msk.f32.mxu1 %vm1099_vm2, %v1100_v9 }
 0x1d4   :  { %1027 = vmatprep.subr.bf16.mxu1 %v1098_v6 }
 0x1d7   :  { %1029 = vmatpush3.bf16.msra.mxu1 %v1164_v10 }
 0x1d8   :  { %1036 = vmatprep.subr.bf16.mxu1 %v1098_v6 }
 0x2a5   :  { %v349_v27 = vpop.f32.mrb[2].mxu1 }
 0x2a6   :  { %v353_v28 = vadd.f32 %v349_v27, %v279_v26  ;;  %v933_v29 = vpop.f32.mrb[3].mxu1 }
 0x2a8   :  { %1062 = vtanh.f32 %v353_v28 }
 0x2b2   :  { %v1063_v30 = vpop.eup %1062 }
 0x2b3   :  { %943 = vmatmul.mubr.msk.f32.vlgmr.msra.gmra.mrb[4].mxu0 %vm124_vm3, %v1063_v30 }
 0x2b4   :  { %1032 = vmatpush3.bf16.msra.mxu0 %v1156_v7  ;;  %964 = vmatprep.mubr.msk.f32.mxu0 %vm1099_vm2, %v1100_v9 }
 0x2b5   :  { %1033 = vmatprep.subr.bf16.mxu0 %v1098_v6 }
 0x2b8   :  { %1035 = vmatpush3.bf16.msra.mxu0 %v1164_v10 }
 0x2b9   :  { %1042 = vmatprep.subr.bf16.mxu0 %v1098_v6 }
 0x386   :  { %v425_v32 = vpop.f32.mrb[4].mxu0 }
 0x387   :  { %v429_v33 = vadd.f32 %v425_v32, %v355_v31  ;;  %v944_v34 = vpop.f32.mrb[5].mxu0 }
 0x389   :  { %1064 = vtanh.f32 %v429_v33 }
 0x393   :  { %v1065_v35 = vpop.eup %1064 }
 0x394   :  { %954 = vmatmul.mubr.msk.f32.vlgmr.msra.gmra.mrb[4].mxu1 %vm124_vm3, %v1065_v35 }
 0x395   :  { %1038 = vmatpush3.bf16.msra.mxu1 %v1156_v7  ;;  %975 = vmatprep.mubr.msk.f32.mxu1 %vm1099_vm2, %v1100_v9 }
 0x396   :  { %1039 = vmatprep.subr.bf16.mxu1 %v1098_v6 }
 0x399   :  { %1041 = vmatpush3.bf16.msra.mxu1 %v1164_v10 }
 0x39a   :  { %1048 = vmatprep.subr.bf16.mxu1 %v1098_v6 }
 0x467   :  { %v501_v37 = vpop.f32.mrb[4].mxu1 }
 0x468   :  { %v505_v38 = vadd.f32 %v501_v37, %v431_v36  ;;  %v955_v39 = vpop.f32.mrb[5].mxu1 }
 0x46a   :  { %1066 = vtanh.f32 %v505_v38 }
 0x474   :  { %v1067_v40 = vpop.eup %1066 }
 0x475   :  { %965 = vmatmul.mubr.msk.f32.vlgmr.msra.gmra.mrb[6].mxu0 %vm124_vm3, %v1067_v40 }
 0x476   :  { %1044 = vmatpush3.bf16.msra.mxu0 %v1156_v7  ;;  %986 = vmatprep.mubr.msk.f32.mxu0 %vm1099_vm2, %v1100_v9 }
 0x477   :  { %1045 = vmatprep.subr.bf16.mxu0 %v1098_v6 }
 0x47a   :  { %1047 = vmatpush3.bf16.msra.mxu0 %v1164_v10 }
 0x548   :  { %v577_v42 = vpop.f32.mrb[6].mxu0 }
 0x549   :  { %v581_v43 = vadd.f32 %v577_v42, %v507_v41  ;;  %v966_v44 = vpop.f32.mrb[7].mxu0 }
 0x54b   :  { %1068 = vtanh.f32 %v581_v43 }
 0x555   :  { %v1069_v45 = vpop.eup %1068 }
 0x556   :  { %976 = vmatmul.mubr.msk.f32.vlgmr.msra.gmra.mrb[6].mxu1 %vm124_vm3, %v1069_v45 }
 0x557   :  { %997 = vmatprep.mubr.msk.f32.mxu1 %vm1099_vm2, %v1100_v9  ;;  %1050 = vmatpush3.bf16.msra.mxu1 %v1049_v54 }
 0x558   :  { %1051 = vmatprep.subr.bf16.mxu1 %v1098_v6 }
 0x55b   :  { %1053 = vmatpush3.bf16.msra.mxu1 %v1052_v56 }
 0x629   :  { %v653_v47 = vpop.f32.mrb[6].mxu1 }
 0x62a   :  { %v657_v48 = vadd.f32 %v653_v47, %v583_v46  ;;  %v977_v49 = vpop.f32.mrb[7].mxu1 }
 0x62c   :  { %1070 = vtanh.f32 %v657_v48 }
 0x636   :  { %v1071_v50 = vpop.eup %1070 }
 0x637   :  { %987 = vmatmul.mubr.msk.f32.vlgmr.msra.gmra.mrb[8].mxu0 %vm124_vm3, %v1071_v50 }
 0x70a   :  { %v729_v58 = vpop.f32.mrb[8].mxu0 }
 0x70b   :  { %v733_v59 = vadd.f32 %v729_v58, %v659_v57  ;;  %v988_v60 = vpop.f32.mrb[9].mxu0 }
 0x70d   :  { %1072 = vtanh.f32 %v733_v59 }
 0x717   :  { %v1073_v61 = vpop.eup %1072 }
 0x718   :  { %998 = vmatmul.mubr.msk.f32.vlgmr.msra.gmra.mrb[8].mxu1 %vm124_vm3, %v1073_v61 }
 0x7eb   :  { %v815_v63 = vpop.f32.mrb[8].mxu1 }
 0x7ec   :  { %v816_v0 = vadd.f32 %v846_v62, %v815_v63  ;;  %v999_v1 = vpop.f32.mrb[9].mxu1 }
 0x7ee   :  { %820 = vst.msk [vmem:[#allocation3] sm:$0x3] %vm819_vm4, %v816_v0 }
 0x7ef   :  { %1085 = shalt.err (!%p1082_p4)
}
 0x7f0   :  { %s1086_s23 = scalar_lea.hbm %s1261_s6, 32 }
 0x7f1   :  { %p1087_p5 = scmp.ne.s32.totalorder %s1261_s6, %s1086_s23  ;;  %p1090_p6 = scmp.lt.u32.totalorder %s1086_s23, %s1261_s6 }
 0x7f3   :  { %p1092_p7 = pnand %p1090_p6, %p1087_p5 }
 0x7f5   :  { %1095 = shalt.err (!%p1092_p7)
}
 0x7f6   :  { %830 = dma.vmem_to_hbm [thread:$0]  %s828_s20, 32, %s1261_s6, [#allocation4]  }
 0x7f7   :  { %1096 = dma.done.wait [#allocation4], 32  }
 0x7f8   :  { %1097 = vsyncadd [#allocation4], 4294967264 }
 0x7f9   :  { %834 = vsyncpa [#allocation4], 1 }

</bundles_post_ra>
